<compile_context>
chip_gen: v6e
topology: v6e:2x2x1
jax: 0.10.0
libtpu: 0.0.40
codegen_flags: <defaults>
</compile_context>

<pallas_src>
import jax
import jax.numpy as jnp
from jax.experimental import pallas as pl
from jax.experimental.pallas import tpu as pltpu


def _round_up(x, m):
    return ((x + m - 1) // m) * m


# ---------------------------------------------------------------------------
# Fused patch-projection kernel: out = patches @ w + bias
# ---------------------------------------------------------------------------
def _patch_proj_kernel(p_ref, w_ref, b_ref, o_ref):
    # p_ref: (tile_m, K) compute dtype; w_ref: (K, tile_n) compute dtype;
    # b_ref: (1, tile_n) f32; o_ref: (tile_m, tile_n) out dtype.
    acc = jnp.dot(p_ref[...], w_ref[...], preferred_element_type=jnp.float32)
    o_ref[...] = (acc + b_ref[...]).astype(o_ref.dtype)


def patch_projection_pallas(patches, w, bias, *, tile_m=256, tile_n=256,
                            compute_dtype=jnp.bfloat16, out_dtype=None):
    """patches: (M, K) @ w: (K, N) + bias: (N,) -> (M, N)."""
    M, K = patches.shape
    K2, N = w.shape
    assert K == K2
    out_dtype = out_dtype if out_dtype is not None else patches.dtype

    # bf16 packs 2 rows per sublane -> keep row tiles multiples of 16.
    row_align = 16 if compute_dtype == jnp.bfloat16 else 8
    tile_m = max(row_align,
                 min(_round_up(tile_m, row_align), _round_up(M, row_align)))
    tile_n = max(128, min(_round_up(tile_n, 128), _round_up(N, 128)))

    Mp = _round_up(M, tile_m)
    Np = _round_up(N, tile_n)

    # Zero-pad so the grid is a clean cdiv; padded rows/cols are sliced off.
    p_pad = jnp.pad(patches.astype(compute_dtype), ((0, Mp - M), (0, 0)))
    w_pad = jnp.pad(w.astype(compute_dtype), ((0, 0), (0, Np - N)))
    b_pad = jnp.pad(bias.astype(jnp.float32), (0, Np - N)).reshape(1, Np)

    grid = (Mp // tile_m, Np // tile_n)
    out = pl.pallas_call(
        _patch_proj_kernel,
        out_shape=jax.ShapeDtypeStruct((Mp, Np), out_dtype),
        grid=grid,
        in_specs=[
            pl.BlockSpec((tile_m, K), lambda i, j: (i, 0)),   # patch rows
            pl.BlockSpec((K, tile_n), lambda i, j: (0, j)),   # weight N-tile
            pl.BlockSpec((1, tile_n), lambda i, j: (0, j)),   # bias N-tile
        ],
        out_specs=pl.BlockSpec((tile_m, tile_n), lambda i, j: (i, j)),
        compiler_params=pltpu.CompilerParams(
            dimension_semantics=("parallel", "parallel")),
    )(p_pad, w_pad, b_pad)
    return out[:M, :N]


# ---------------------------------------------------------------------------
# PatchEmbed wrapper (same forward semantics as the PyTorch module)
# ---------------------------------------------------------------------------
class PatchEmbedPallas:
    def __init__(self, img_size, patch_size, tube_size=2, in_channels=3,
                 embed_dims=768, conv_type='Conv2d', *,
                 key=None, compute_dtype=jnp.bfloat16):
        _pair = lambda v: (v, v) if isinstance(v, int) else tuple(v)
        self.img_size = _pair(img_size)
        self.patch_size = _pair(patch_size)
        num_patches = (self.img_size[1] // self.patch_size[1]) * \
                      (self.img_size[0] // self.patch_size[0])
        assert num_patches * self.patch_size[0] * self.patch_size[1] == \
            self.img_size[0] * self.img_size[1], \
            'The image size H*W must be divisible by patch size'
        self.num_patches = num_patches
        self.tube_size = tube_size
        self.in_channels = in_channels
        self.embed_dims = embed_dims
        self.conv_type = conv_type
        self.compute_dtype = compute_dtype

        ph, pw = self.patch_size
        if conv_type == 'Conv2d':
            w_shape = (embed_dims, in_channels, ph, pw)
            fan_in = in_channels * ph * pw
        elif conv_type == 'Conv3d':
            w_shape = (embed_dims, in_channels, tube_size, ph, pw)
            fan_in = in_channels * tube_size * ph * pw
        else:
            raise TypeError(f'Unsupported conv layer type {conv_type}')

        key = key if key is not None else jax.random.PRNGKey(0)
        # kaiming_init_(mode='fan_in', nonlinearity='relu') -> N(0, sqrt(2/fan_in))
        std = (2.0 / fan_in) ** 0.5
        self.weight = std * jax.random.normal(key, w_shape, dtype=jnp.float32)
        # constant_init_(bias, 0)
        self.bias = jnp.zeros((embed_dims,), dtype=jnp.float32)

    def __call__(self, x):
        ph, pw = self.patch_size
        E = self.embed_dims
        if self.conv_type == 'Conv2d':
            B, T, C, H, W = x.shape
            Hp, Wp = H // ph, W // pw
            # 'b t c h w -> (b t) c h w'; stride==kernel conv == patch gather.
            xp = x.reshape(B * T, C, Hp, ph, Wp, pw)
            patches = xp.transpose(0, 2, 4, 1, 3, 5).reshape(
                B * T * Hp * Wp, C * ph * pw)
            w2 = self.weight.reshape(E, C * ph * pw).T           # (K, E)
            out = patch_projection_pallas(
                patches, w2, self.bias,
                compute_dtype=self.compute_dtype, out_dtype=x.dtype)
            # conv out 'b c h w -> b (h w) c' == our (bt, hp, wp) row order.
            return out.reshape(B * T, Hp * Wp, E)
        elif self.conv_type == 'Conv3d':
            B, T, C, H, W = x.shape
            tb = self.tube_size
            Tt, Hp, Wp = T // tb, H // ph, W // pw
            # 'b t c h w -> b c t h w', Conv3d stride==kernel,
            # then 'b c t h w -> b t (h w) c'.
            xp = x.transpose(0, 2, 1, 3, 4).reshape(
                B, C, Tt, tb, Hp, ph, Wp, pw)
            patches = xp.transpose(0, 2, 4, 6, 1, 3, 5, 7).reshape(
                B * Tt * Hp * Wp, C * tb * ph * pw)
            w2 = self.weight.reshape(E, C * tb * ph * pw).T
            out = patch_projection_pallas(
                patches, w2, self.bias,
                compute_dtype=self.compute_dtype, out_dtype=x.dtype)
            return out.reshape(B, Tt, Hp * Wp, E)
        else:
            raise TypeError(f'Unsupported conv layer type {self.conv_type}')


if __name__ == "__main__":
    key = jax.random.PRNGKey(0)
    kx, kw = jax.random.split(key, 2)

    # Small shapes consistent with the module: (b, t, c, h, w)
    B, T, C, H = 2, 2, 3, 16
    patch = 8
    embed_dims = 128  # lane-dense output (multiple of 128)

    x = jax.random.normal(kx, (B, T, C, H, H), dtype=jnp.float32)

    pe = PatchEmbedPallas(img_size=H, patch_size=patch, in_channels=C,
                          embed_dims=embed_dims, conv_type='Conv2d',
                          key=kw, compute_dtype=jnp.bfloat16)

    out = pe(x)
    jax.block_until_ready(out)
    assert out.shape == (B * T, pe.num_patches, embed_dims), out.shape

    # --- reference 1: identical bf16-cast operands, plain jnp matmul -------
    ph = pw = patch
    Hp = Wp = H // patch
    x2 = x.reshape(B * T, C, H, H)
    patches = x2.reshape(B * T, C, Hp, ph, Wp, pw).transpose(0, 2, 4, 1, 3, 5)
    patches = patches.reshape(B * T * Hp * Wp, C * ph * pw)
    wf = pe.weight.reshape(embed_dims, C * ph * pw).T
    ref_mm = (jnp.dot(patches.astype(jnp.bfloat16), wf.astype(jnp.bfloat16),
                      preferred_element_type=jnp.float32) + pe.bias)
    ref_mm = ref_mm.astype(x.dtype).reshape(B * T, Hp * Wp, embed_dims)
    assert jnp.allclose(out, ref_mm, atol=2e-2, rtol=2e-2), \
        "mismatch vs bf16 matmul reference"

    # --- reference 2: f32 strided conv (validates patch-extraction layout) -
    ref_conv = jax.lax.conv_general_dilated(
        x2, pe.weight, window_strides=(patch, patch), padding='VALID',
        dimension_numbers=('NCHW', 'OIHW', 'NCHW'))
    ref_conv = ref_conv + pe.bias[None, :, None, None]
    ref_conv = ref_conv.transpose(0, 2, 3, 1).reshape(
        B * T, Hp * Wp, embed_dims)
    assert jnp.allclose(out, ref_conv, atol=8e-2, rtol=8e-2), \
        "mismatch vs conv reference (bf16 tolerance)"

    print("KERNEL_OK")
</pallas_src>

<mosaic_0001>
module attributes {stable_mosaic.version = 11 : i64} {
  func.func @_patch_proj_kernel(%arg0: i32, %arg1: i32, %arg2: memref<16x192xbf16, #tpu.memory_space<vmem>>, %arg3: memref<192x128xbf16, #tpu.memory_space<vmem>>, %arg4: memref<1x128xf32, #tpu.memory_space<vmem>>, %arg5: memref<16x128xf32, #tpu.memory_space<vmem>>) attributes {dimension_semantics = [#tpu.dimension_semantics<parallel>, #tpu.dimension_semantics<parallel>], iteration_bounds = array<i64: 1, 1>, scalar_prefetch = 0 : i64, scratch_operands = 0 : i64, tpu.core_type = #tpu.core_type<tc>, window_params = [{transform_indices = @transform_0, window_bounds = array<i64: 16, 192>}, {transform_indices = @transform_1, window_bounds = array<i64: 192, 128>}, {transform_indices = @transform_2, window_bounds = array<i64: 1, 128>}, {transform_indices = @transform_3, window_bounds = array<i64: 16, 128>}]} {
    %c0 = arith.constant 0 : index
    %c0_0 = arith.constant 0 : index
    %0 = vector.load %arg2[%c0, %c0_0] : memref<16x192xbf16, #tpu.memory_space<vmem>>, vector<16x192xbf16>
    %c0_1 = arith.constant 0 : index
    %c0_2 = arith.constant 0 : index
    %1 = vector.load %arg3[%c0_1, %c0_2] : memref<192x128xbf16, #tpu.memory_space<vmem>>, vector<192x128xbf16>
    %cst = arith.constant dense<0.000000e+00> : vector<16x128xf32>
    %2 = tpu.matmul %0, %1, %cst {dimension_numbers = #tpu.dot_dimension_numbers<[1], [0], [0], [1], [0, 0, 1, 1], [], []>} : vector<16x192xbf16>, vector<192x128xbf16>, vector<16x128xf32> -> vector<16x128xf32>
    %c0_3 = arith.constant 0 : index
    %c0_4 = arith.constant 0 : index
    %3 = vector.load %arg4[%c0_3, %c0_4] : memref<1x128xf32, #tpu.memory_space<vmem>>, vector<1x128xf32>
    %4 = vector.broadcast %3 : vector<1x128xf32> to vector<16x128xf32>
    %5 = arith.addf %2, %4 : vector<16x128xf32>
    %c0_5 = arith.constant 0 : index
    %c0_6 = arith.constant 0 : index
    %6 = vector.load %arg5[%c0_5, %c0_6] : memref<16x128xf32, #tpu.memory_space<vmem>>, vector<16x128xf32>
    tpu.vector_store %arg5[%c0_5, %c0_6], %5 {strides = array<i32>} : memref<16x128xf32, #tpu.memory_space<vmem>>, vector<16x128xf32>,
    return
  }
  func.func @transform_0(%arg0: i32, %arg1: i32) -> (i32, i32) {
    %c0_i32 = arith.constant 0 : i32
    %c0_i32_0 = arith.constant 0 : i32
    return %arg0, %c0_i32 : i32, i32
  }
  func.func @transform_1(%arg0: i32, %arg1: i32) -> (i32, i32) {
    %c0_i32 = arith.constant 0 : i32
    %c0_i32_0 = arith.constant 0 : i32
    return %c0_i32, %arg1 : i32, i32
  }
  func.func @transform_2(%arg0: i32, %arg1: i32) -> (i32, i32) {
    %c0_i32 = arith.constant 0 : i32
    %c0_i32_0 = arith.constant 0 : i32
    return %c0_i32, %arg1 : i32, i32
  }
  func.func @transform_3(%arg0: i32, %arg1: i32) -> (i32, i32) {
    %c0_i32 = arith.constant 0 : i32
    return %arg0, %arg1 : i32, i32
  }
}

</mosaic_0001>

<bundles_post_ra>
// kernel: tpu_custom_call.1
= control target key start
LH: loop header
LB: loop body
LE: loop exit
PB: predicated region body
PF: predicated region fallthrough
CT: control target
= control target key end

     0   :  { %8 = vsyncpa [#allocation3], 0  ;;  %s374_s0 = inlined_call_operand.hbm [shape: bf16[16,192], index: 0, kind: input, shape index: {}]   ;;  %s375_s1 = inlined_call_operand.hbm [shape: bf16[192,128], index: 1, kind: input, shape index: {}]   ;;  %s376_s2 = inlined_call_operand.vmem [shape: f32[1,128], index: 2, kind: input, shape index: {}]   ;;  %s377_s3 = inlined_call_operand.hbm [shape: f32[16,128], index: 3, kind: output, shape index: {}]  }
   0x1   :  { %9 = vsyncpa [#allocation6], 0 }
   0x2   :  { %10 = vsyncpa [#allocation4], 0  ;;  %s328_s12 = smov [#allocation2]  }
   0x3   :  { %s16_s13 = sshll.u32 %s328_s12, 4  ;;  %s17_s13 = int_to_ptr.vmem [resolvable:$true] %s16_s13 }
   0x4   :  { %s270_s14 = scalar_lea.vmem %s17_s13, 256  ;;  %p275_p1 = scmp.lt.s32.totalorder %s17_s13, %s17_s13 }
   0x5   :  { %p271_p0 = scmp.ne.s32.totalorder %s17_s13, %s270_s14  ;;  %p276_p2 = scmp.lt.s32.totalorder %s270_s14, %s270_s14 }
   0x7   :  { %p277_p3 = por %p276_p2, %p275_p1 }
   0x9   :  { %p278_p4 = pnand %p277_p3, %p271_p0 }
   0xb   :  { %281 = shalt.err (!%p278_p4)
}
   0xc   :  { %s329_s15 = smov 128   ;;  %s330_s16 = smov 8  }
   0xd   :  { %22 = dma.hbm_to_vmem [thread:$0]  %s374_s0, 256, %s17_s13, [#allocation3], %s329_s15, %s329_s15, %s330_s16  }
   0xe   :  { %s331_s19 = smov [#allocation5]  }
   0xf   :  { %s28_s20 = sshll.u32 %s331_s19, 4  ;;  %s29_s20 = int_to_ptr.vmem [resolvable:$true] %s28_s20 }
  0x10   :  { %s290_s21 = scalar_lea.vmem %s29_s20, 1536  ;;  %p295_p6 = scmp.lt.s32.totalorder %s29_s20, %s29_s20 }
  0x11   :  { %p291_p5 = scmp.ne.s32.totalorder %s29_s20, %s290_s21  ;;  %p296_p7 = scmp.lt.s32.totalorder %s290_s21, %s290_s21 }
  0x13   :  { %p297_p8 = por %p296_p7, %p295_p6 }
  0x15   :  { %p298_p9 = pnand %p297_p8, %p291_p5 }
  0x17   :  { %301 = shalt.err (!%p298_p9)
}
  0x18   :  { %s332_s22 = smov 64   ;;  %s333_s23 = smov 4  }
  0x19   :  { %34 = dma.hbm_to_vmem [thread:$0]  %s375_s1, 1536, %s29_s20, [#allocation6], %s332_s22, %s332_s22, %s333_s23  }
  0x1a   :  { %322 = dma.done.wait [#allocation3], 256  }
  0x1b   :  { %323 = vsyncadd [#allocation3], 4294967040 }
  0x1c   :  { %324 = dma.done.wait [#allocation6], 1536  }
  0x1d   :  { %325 = vsyncadd [#allocation6], 4294965760  ;;  %v334_v0 = vmov 0   ;;  %v247_v1 = vld [vmem:[#allocation5 + $0x38] sm:$0xff]   ;;  %v248_v2 = vld [vmem:[#allocation5 + $0x30] sm:$0xff]   ;;  %vm158_vm0 = vcmask 523264  }
  0x1e   :  { %162 = vmatprep.subr.bf16.mxu0 %v334_v0  ;;  %v249_v3 = vld [vmem:[#allocation5 + $0x28] sm:$0xff]   ;;  %v250_v4 = vld [vmem:[#allocation5 + $0x20] sm:$0xff]   ;;  %v261_v5 = vld [vmem:[#allocation2 + $0x4] ss:$8 sps:$4 sm:$0xff]   ;;  %s335_s26 = smov [#allocation7]  }
  0x1f   :  { %163 = vmatpush1.bf16.msra.mxu0 %v247_v1  ;;  %v251_v6 = vld [vmem:[#allocation5 + $0x18] sm:$0xff]   ;;  %238 = vmatprep.mubr.msk.bf16.mxu0 %vm158_vm0, %v261_v5  ;;  %v252_v7 = vld [vmem:[#allocation5 + $0x10] sm:$0xff]   ;;  %v253_v8 = vld [vmem:[#allocation5 + $0x8] sm:$0xff]   ;;  %s210_s27 = sshll.u32 %s335_s26, 4  ;;  %s211_s27 = int_to_ptr.vmem [resolvable:$true] %s210_s27 }
  0x20   :  { %164 = vmatprep.subr.bf16.mxu0 %v334_v0  ;;  %v254_v9 = vld [vmem:[#allocation5] sm:$0xff]   ;;  %v255_v10 = vld [vmem:[#allocation5 + $0x58] sm:$0xff]   ;;  %v256_v11 = vld [vmem:[#allocation5 + $0x50] sm:$0xff]   ;;  %s302_s28 = scalar_lea.vmem %s211_s27, 256  ;;  %p307_p11 = scmp.lt.s32.totalorder %s211_s27, %s211_s27 }
  0x21   :  { %v257_v12 = vld [vmem:[#allocation5 + $0x48] sm:$0xff]   ;;  %v258_v13 = vld [vmem:[#allocation5 + $0x40] sm:$0xff]   ;;  %v259_v14 = vld [vmem:[#allocation2] ss:$8 sps:$4 sm:$0xff]   ;;  %p303_p10 = scmp.ne.s32.totalorder %s211_s27, %s302_s28  ;;  %p308_p12 = scmp.lt.s32.totalorder %s302_s28, %s302_s28 }
  0x22   :  { %v223_v15 = vld [vmem:[%s376_s2] ss:$0 sm:$0xff] }
  0x23   :  { %165 = vmatpush1.bf16.msra.mxu0 %v248_v2  ;;  %p309_p13 = por %p308_p12, %p307_p11 }
  0x24   :  { %166 = vmatprep.subr.bf16.mxu0 %v334_v0 }
  0x25   :  { %p310_p0 = pnand %p309_p13, %p303_p10 }
  0x27   :  { %167 = vmatpush1.bf16.msra.mxu0 %v249_v3 }
  0x28   :  { %168 = vmatprep.subr.bf16.mxu0 %v334_v0 }
  0x2b   :  { %169 = vmatpush1.bf16.msra.mxu0 %v250_v4 }
  0x2c   :  { %170 = vmatprep.subr.bf16.mxu0 %v334_v0 }
  0x2f   :  { %171 = vmatpush1.bf16.msra.mxu0 %v251_v6 }
  0x30   :  { %172 = vmatprep.subr.bf16.mxu0 %v334_v0 }
  0x33   :  { %173 = vmatpush1.bf16.msra.mxu0 %v252_v7 }
  0x34   :  { %174 = vmatprep.subr.bf16.mxu0 %v334_v0 }
  0x37   :  { %175 = vmatpush1.bf16.msra.mxu0 %v253_v8 }
  0x38   :  { %176 = vmatprep.subr.bf16.mxu0 %v334_v0 }
  0x3b   :  { %177 = vmatpush1.bf16.msra.mxu0 %v254_v9 }
  0x3c   :  { %186 = vmatprep.subr.bf16.mxu0 %v334_v0 }
  0x3f   :  { %187 = vmatpush2.bf16.msra.mxu0 %v255_v10 }
  0x40   :  { %188 = vmatprep.subr.bf16.mxu0 %v334_v0 }
  0x43   :  { %189 = vmatpush2.bf16.msra.mxu0 %v256_v11 }
  0x44   :  { %190 = vmatprep.subr.bf16.mxu0 %v334_v0 }
  0x47   :  { %191 = vmatpush2.bf16.msra.mxu0 %v257_v12 }
  0x48   :  { %192 = vmatprep.subr.bf16.mxu0 %v334_v0 }
  0x4b   :  { %193 = vmatpush2.bf16.msra.mxu0 %v258_v13 }
  0x4e   :  { %195 = vmatmul.mubr.bf16.vlgmr.msra.gmra.mxu0 %v259_v14 }
 0x10e   :  { %v196_v16 = vpop.f32.mrf.mxu0 }
 0x10f   :  { %v197_v17 = vadd.f32 %v223_v15, %v196_v16 }
 0x110   :  { %v198_v18 = vpop.f32.mrf.mxu0 }
 0x111   :  { %203 = vst [vmem:[#allocation7] sm:$0xff] %v197_v17 }
 0x112   :  { %v199_v19 = vpop.f32.mrf.mxu0 }
 0x113   :  { %v200_v20 = vadd.f32 %v223_v15, %v199_v19 }
 0x114   :  { %v201_v21 = vpop.f32.mrf.mxu0 }
 0x115   :  { %204 = vst [vmem:[#allocation7 + $0x8] sm:$0xff] %v200_v20 }
 0x116   :  { %313 = shalt.err (!%p310_p0)
}
 0x117   :  { %216 = dma.vmem_to_hbm [thread:$0]  %s211_s27, 256, %s377_s3, [#allocation4], %s329_s15, %s329_s15, %s330_s16  }
 0x118   :  { %326 = dma.done.wait [#allocation4], 256  }
 0x119   :  { %327 = vsyncadd [#allocation4], 4294967040 }
 0x11a   :  { %220 = vsyncpa [#allocation3], 1 }
 0x11b   :  { %221 = vsyncpa [#allocation6], 1 }
 0x11c   :  { %222 = vsyncpa [#allocation4], 1 }

</bundles_post_ra>
